<compile_context>
chip_gen: v5e
topology: v5e:2x2
jax: 0.10.0
libtpu: 0.0.40
codegen_flags: <defaults>
</compile_context>

<pallas_src>
import functools

import jax
import jax.numpy as jnp
from jax.experimental import pallas as pl
from jax.experimental.pallas import tpu as pltpu

_LANE = 128
_TARGET_BLOCK_BYTES = 8 << 20   # ~8 MiB per block amortizes ~0.35us/step overhead


def _softplus_kernel(x_ref, o_ref, *, compute_dtype):
    # Stable softplus: log(exp(x)+1) == max(x,0) + log1p(exp(-|x|)).
    # NOTE: the ragged final grid block may contain garbage lanes past the end
    # of the array; they flow harmlessly through this elementwise math and are
    # masked on the store. A future reduction variant must mask explicitly.
    x = x_ref[...].astype(compute_dtype)
    y = jnp.maximum(x, 0.0) + jnp.log1p(jnp.exp(-jnp.abs(x)))
    o_ref[...] = y.astype(o_ref.dtype)


def _bf16_transcendentals_ok() -> bool:
    """bf16 VPU/EUP exists on v6e/v7x; v5e and older need the f32 path."""
    try:
        kind = jax.devices()[0].device_kind.lower()
    except Exception:
        return False
    return ("v6" in kind) or ("v7" in kind)


def softplus_pallas(x: jax.Array) -> jax.Array:
    """Elementwise softplus via a Pallas TPU kernel on a lane-dense (rows,128) slab."""
    orig_shape = x.shape
    orig_dtype = x.dtype
    dtype_bytes = jnp.dtype(orig_dtype).itemsize

    flat = x.reshape(-1)
    n = flat.shape[0]
    rows = pl.cdiv(n, _LANE)
    padded_n = rows * _LANE
    needs_pad = padded_n != n
    if needs_pad:
        # Only to the next multiple of 128 (<= 127 elements), never a full tile.
        flat = jnp.pad(flat, (0, padded_n - n))
    slab = flat.reshape(rows, _LANE)

    if rows <= 8:
        # Tiny input: one block whose sublane extent equals the full array dim.
        tile_rows = rows
    else:
        # Size blocks by bytes (same block bytes for bf16/f32), but cap so there
        # are always >= 2 roughly balanced blocks for v7x's two TensorCores.
        tile_by_bytes = max(8, (_TARGET_BLOCK_BYTES // (_LANE * dtype_bytes)) // 8 * 8)
        half_rows = ((pl.cdiv(rows, 2) + 7) // 8) * 8
        tile_rows = min(tile_by_bytes, half_rows)
    num_blocks = pl.cdiv(rows, tile_rows)

    block_bytes = tile_rows * _LANE * dtype_bytes
    # double-buffered input + output blocks + slack; <= 48 MiB keeps headroom on
    # v7x's 64 MiB per-TC VMEM and overrides v5e's 16 MiB scoped default.
    vmem_limit = min(max(4 * block_bytes + (4 << 20), 16 << 20), 48 << 20)

    compute_dtype = (
        jnp.bfloat16
        if (orig_dtype == jnp.bfloat16 and _bf16_transcendentals_ok())
        else jnp.float32
    )

    out = pl.pallas_call(
        functools.partial(_softplus_kernel, compute_dtype=compute_dtype),
        out_shape=jax.ShapeDtypeStruct((rows, _LANE), orig_dtype),
        grid_spec=pltpu.PrefetchScalarGridSpec(
            num_scalar_prefetch=0,
            grid=(num_blocks,),
            in_specs=[pl.BlockSpec((tile_rows, _LANE), lambda i: (i, 0))],
            out_specs=pl.BlockSpec((tile_rows, _LANE), lambda i: (i, 0)),
        ),
        compiler_params=pltpu.CompilerParams(
            dimension_semantics=("parallel",),   # shards blocks across v7x's 2 TCs
            vmem_limit_bytes=vmem_limit,
        ),
        cost_estimate=pl.CostEstimate(
            flops=5 * n,
            transcendentals=2 * n,
            bytes_accessed=2 * n * dtype_bytes,
        ),
    )(slab)

    if needs_pad:
        out = out.reshape(-1)[:n]
    return out.reshape(orig_shape)


if __name__ == "__main__":
    key = jax.random.PRNGKey(0)
    # NCHW-style input consistent with the module's generic elementwise forward.
    x = jax.random.normal(key, (2, 4, 16, 16), dtype=jnp.float32)

    y = jax.block_until_ready(softplus_pallas(x))

    # Correctness vs. the module's exact formula (finite / non-overflowing range).
    y_ref = jnp.log(jnp.exp(x) + 1.0)
    assert y.shape == x.shape and y.dtype == x.dtype
    assert jnp.allclose(y, y_ref, atol=1e-6, rtol=1e-6)

    # Large magnitudes + unaligned (n % 128 != 0) shape exercises the small-pad path.
    x_big = jnp.array([[-200.0, -20.0, 0.0, 20.0, 200.0]] * 8, dtype=jnp.float32)
    y_big = jax.block_until_ready(softplus_pallas(x_big))
    assert jnp.all(jnp.isfinite(y_big))
    assert jnp.allclose(y_big, jax.nn.softplus(x_big), atol=1e-5, rtol=1e-5)

    # bf16 path: bf16 math on v6e/v7x, f32 math on v5e; storage stays bf16.
    x_bf16 = x.astype(jnp.bfloat16)
    y_bf16 = jax.block_until_ready(softplus_pallas(x_bf16))
    assert y_bf16.dtype == jnp.bfloat16
    assert jnp.allclose(y_bf16.astype(jnp.float32),
                        jax.nn.softplus(x_bf16.astype(jnp.float32)),
                        atol=2e-2, rtol=2e-2)

    print("KERNEL_OK")
</pallas_src>

<mosaic_0001>
module attributes {stable_mosaic.version = 11 : i64} {
  func.func @_softplus_kernel(%arg0: i32, %arg1: memref<8x128xf32, #tpu.memory_space<vmem>>, %arg2: memref<8x128xf32, #tpu.memory_space<vmem>>) attributes {dimension_semantics = [#tpu.dimension_semantics<parallel>], iteration_bounds = array<i64: 2>, scalar_prefetch = 0 : i64, scratch_operands = 0 : i64, tpu.core_type = #tpu.core_type<tc>, window_params = [{transform_indices = @transform_0, window_bounds = array<i64: 8, 128>}, {transform_indices = @transform_1, window_bounds = array<i64: 8, 128>}]} {
    %c0 = arith.constant 0 : index
    %c0_0 = arith.constant 0 : index
    %0 = vector.load %arg1[%c0, %c0_0] : memref<8x128xf32, #tpu.memory_space<vmem>>, vector<8x128xf32>
    %cst = arith.constant 0.000000e+00 : f32
    %1 = vector.broadcast %cst : f32 to vector<8x128xf32>
    %2 = arith.maximumf %0, %1 : vector<8x128xf32>
    %3 = math.absf %0 : vector<8x128xf32>
    %cst_1 = arith.constant 0.000000e+00 : f32
    %4 = vector.broadcast %cst_1 : f32 to vector<8x128xf32>
    %5 = arith.subf %4, %3 : vector<8x128xf32>
    %6 = math.exp %5 : vector<8x128xf32>
    %7 = math.log1p %6 : vector<8x128xf32>
    %8 = arith.addf %2, %7 : vector<8x128xf32>
    %c0_2 = arith.constant 0 : index
    %c0_3 = arith.constant 0 : index
    %9 = vector.load %arg2[%c0_2, %c0_3] : memref<8x128xf32, #tpu.memory_space<vmem>>, vector<8x128xf32>
    tpu.vector_store %arg2[%c0_2, %c0_3], %8 {strides = array<i32>} : memref<8x128xf32, #tpu.memory_space<vmem>>, vector<8x128xf32>,
    return
  }
  func.func @transform_0(%arg0: i32) -> (i32, i32) {
    %c0_i32 = arith.constant 0 : i32
    %c0_i32_0 = arith.constant 0 : i32
    return %arg0, %c0_i32 : i32, i32
  }
  func.func @transform_1(%arg0: i32) -> (i32, i32) {
    %c0_i32 = arith.constant 0 : i32
    %c0_i32_0 = arith.constant 0 : i32
    return %arg0, %c0_i32 : i32, i32
  }
}

</mosaic_0001>

<bundles_post_ra>
// kernel: tpu_custom_call.1
= control target key start
LH: loop header
LB: loop body
LE: loop exit
PB: predicated region body
PF: predicated region fallthrough
CT: control target
= control target key end

     0   :  { %6 = vsyncpa [#allocation3], 0  ;;  %s534_s0 = inlined_call_operand.hbm [shape: f32[16,128], index: 0, kind: input, shape index: {}]   ;;  %s535_s1 = inlined_call_operand.hbm [shape: f32[16,128], index: 1, kind: output, shape index: {}]  }
   0x1   :  { %8 = vsyncpa [#allocation3 + $0x1], 0 }
   0x2   :  { %9 = vsyncpa [#allocation4], 0 }
   0x3   :  { %11 = vsyncpa [#allocation4 + $0x1], 0  ;;  %s407_s6 = smov 0   ;;  %s409_s7 = smov 0  }
   0x4   :  { %s411_s8 = smov 0   ;;  %s413_s9 = smov 0  }
   0x5 LB: > { %s428_s10 = sadd.s32 4294967295, %s395_s9   ;;  %s237_s11 = sadd.s32 4294967294, %s395_s9   ;;  %s395_s9 = sphi %s413_s9, %s545_s9   ;;  %s391_s8 = sphi %s411_s8, %s544_s8   ;;  %s387_s7 = sphi %s409_s7, %s543_s7   ;;  %s383_s6 = sphi %s407_s6, %s542_s6  }
   0x6   : > { %s432_s12 = sadd.s32 1, %s395_s9   ;;  %s24_s13 = sadd.s32 1, %s391_s8 }
   0x7   : > { %s21_s14 = ssub.s32 %s395_s9, %s432_s12  ;;  %p31_p0 = scmp.ne.s32.totalorder %s391_s8, %s387_s7 }
   0x8   : > { %p22_p1 = scmp.eq.s32.totalorder %s21_s14, 0  ;;  %p32_p2 = scmp.eq.s32.totalorder %s395_s9, 0 }
   0x9   : > { %p37_p3 = scmp.ne.s32.totalorder %s387_s7, %s383_s6  ;;  %p38_p4 = scmp.eq.s32.totalorder %s428_s10, 0 }
   0xa   : > { %s444_s15 = scalar_select %p22_p1, %s391_s8, %s24_s13  }
   0xb   : > { %p446_p5 = por %p32_p2, %p31_p0  ;;  %p450_p6 = por %p38_p4, %p37_p3 }
   0xc   : > { %p61_p7 = scmp.eq.s32.totalorder %s428_s10, 1  ;;  %p67_p8 = scmp.eq.s32.totalorder %s237_s11, 1 }
   0xd   : > { %p261_p10 = scmp.lt.s32.totalorder %s395_s9, 2  ;;  %s87_s20 = sand.u32 1, %s391_s8  }
   0xe   : > { %p457_p11 = por %p61_p7, %p31_p0  ;;  %p461_p12 = por %p67_p8, %p37_p3 }
   0xf   : > { %s241_s21 = sshll.u32 %s395_s9, 3  ;;  %s240_s22 = sshll.u32 %s87_s20, 3 }
  0x10   : > { %s95_s25 = scalar_lea.hbm %s534_s0, %s241_s21  ;;  %s91_s27 = scalar_lea.vmem [#allocation2], %s240_s22 }
  0x11   : > { %s97_s26 = sshll.u32 %s95_s25, 4  ;;  %s99_s28 = sshll.u32 %s91_s27, 4  ;;  %s98_s26 = int_to_ptr.hbm [resolvable:$true] %s97_s26  ;;  %s100_s28 = int_to_ptr.vmem [resolvable:$true] %s99_s28 }
  0x12   : > { %p472_p13 = pnand %p261_p10, %p446_p5  ;;  %p242_p0 = scmp.ge.s32.totalorder %s395_s9, 1 }
  0x13   : > { %p104_p1 = scmp.lt.s32.totalorder %s395_s9, 3  ;;  %s88_s30 = scalar_lea.sflag [#allocation3], %s87_s20 }
  0x14   : > { %s299_s2 = sshra.s32 %s98_s26, 4  ;;  %p303_p3 = pneg %p472_p13  ;;  %s300_s2 = int_to_ptr.hbm [resolvable:$true] %s299_s2 }
  0x15   : > { %s301_s3 = scalar_lea.hbm %s300_s2, 8  ;;  %s306_s11 = scalar_lea.hbm %s534_s0, 16 }
  0x16   : > { %p302_p2 = scmp.ne.s32.totalorder %s300_s2, %s301_s3  ;;  %p307_p5 = scmp.lt.s32.totalorder %s300_s2, %s534_s0 }
  0x17   : > { %p308_p8 = scmp.lt.s32.totalorder %s306_s11, %s301_s3 }
  0x18   : > { %p304_p4 = pnand %p303_p3, %p302_p2 }
  0x19   : > { %p309_p10 = por %p308_p8, %p307_p5 }
  0x1a   : > { %p305_p7 = pneg %p304_p4 }
  0x1c   : > { %p310_p9 = pnand %p309_p10, %p305_p7 }
  0x1e   : > { %313 = shalt.err (!%p310_p9)
}
  0x1f   : > { %256 = dma.hbm_to_vmem [thread:$0]  (!%p472_p13), %s98_s26, 128, %s100_s28, %s88_s30  }
  0x20   : > { %p105_p2 = pnand %p242_p0, %p104_p1 }
  0x21   : > { %s493_s16 = sand.u32 (!%p105_p2), 1, %s387_s7  }
  0x22   : > { %108 = sbr.rel (%p105_p2) target bundleno = 71 (0x47), region = 24  ;;  %s243_s20 = sshll.u32 (!%p105_p2), %s493_s16, 3 }
  0x23   : > { %s111_s21 = scalar_lea.sflag (!%p105_p2), [#allocation3], %s493_s16  ;;  %s114_s22 = scalar_lea.vmem (!%p105_p2), [#allocation2], %s243_s20 }
  0x27   : > { %374 = dma.done.wait (%p450_p6), %s111_s21, 128  }
  0x28   : > { %376 = vsyncadd (%p450_p6), %s111_s21, 4294967168  ;;  %v134_v0 = vld [vmem:[%s114_s22] sm:$0xff]  ;;  %s246_s23 = sshll.u32 %s428_s10, 3  ;;  %s133_s17 = scalar_lea.vmem [#allocation5], %s243_s20 }
  0x29   : > { %v136_v1 = vand.u32 2147483647, %v134_v0  ;;  %s162_s26 = scalar_lea.hbm %s535_s1, %s246_s23  ;;  %v135_v11 = vmax.f32 %v134_v0, 0.0  ;;  %s164_s27 = sshll.u32 %s133_s17, 4  ;;  %s165_s27 = int_to_ptr.vmem [resolvable:$true] %s164_s27 }
  0x2a   : > { %s166_s28 = sshll.u32 %s162_s26, 4  ;;  %s152_s10 = scalar_lea.sflag [#allocation4], %s493_s16  ;;  %s167_s28 = int_to_ptr.hbm [resolvable:$true] %s166_s28 }
  0x2b   : > { %v137_v2 = vsub.f32 0.0, %v136_v1  ;;  %s343_s29 = sshra.s32 %s167_s28, 4  ;;  %s349_s4 = scalar_lea.hbm %s535_s1, 16  ;;  %s344_s29 = int_to_ptr.hbm [resolvable:$true] %s343_s29 }
  0x2c   : > { %s345_s30 = scalar_lea.hbm %s344_s29, 8  ;;  %p350_p0 = scmp.lt.s32.totalorder %s344_s29, %s535_s1 }
  0x2d   : > { %v138_v3 = vmul.f32 1.442695, %v137_v2  ;;  %p346_p6 = scmp.ne.s32.totalorder %s344_s29, %s345_s30  ;;  %p351_p1 = scmp.lt.s32.totalorder %s349_s4, %s345_s30 }
  0x2f   : > { %295 = vpow2.f32 %v138_v3  ;;  %p347_p9 = pnand %p346_p6, %p457_p11  ;;  %p352_p3 = por %p351_p1, %p350_p0 }
  0x31   : > { %p348_p13 = pneg %p347_p9 }
  0x33   : > { %p353_p4 = pnand %p352_p3, %p348_p13 }
  0x35   : > { %v296_v4 = vpop.eup %295 }
  0x36   : > { %v140_v5 = vadd.f32 1.0, %v296_v4  ;;  %v143_v6 = vmul.f32 -0.5, %v296_v4  ;;  %v146_v8 = vand.u32 2147483647, %v296_v4 }
  0x38   : > { %297 = vlog2.f32 %v140_v5  ;;  %v144_v7 = vadd.f32 1.0, %v143_v6  ;;  %vm147_vm0 = vcmp.lt.f32.partialorder %v146_v8, 0.0004427343 }
  0x3a   : > { %v145_v9 = vmul.f32 %v296_v4, %v144_v7 }
  0x3e   : > { %v298_v10 = vpop.eup %297 }
  0x3f   : > { %v142_v12 = vmul.f32 0.6931472, %v298_v10 }
  0x41   : > { %v148_v13 = vsel %vm147_vm0, %v145_v9, %v142_v12 }
  0x42   : > { %v149_v14 = vadd.f32 %v148_v13, %v135_v11 }
  0x44   : > { %150 = vst [vmem:[%s133_s17] sm:$0xff] %v149_v14 }
  0x45   : > { %356 = shalt.err (!%p353_p4)
}
  0x46   : > { %251 = dma.vmem_to_hbm [thread:$0]  (%p457_p11), %s165_s27, 128, %s167_s28, %s152_s10  }
  0x47 PF: > { %s178_s13 = sand.u32 1, %s383_s6   ;;  %p541_p7 = scmp.ge.s32.totalorder %s395_s9, 2 }
  0x48   : > { %s179_s14 = scalar_lea.sflag [#allocation4], %s178_s13 }
  0x49   : > { %p258_p5 = pnand %p541_p7, %p461_p12 }
  0x4b   : > { %p259_p8 = pneg %p258_p5 }
  0x4d   : > { %378 = dma.done.wait (%p259_p8), %s179_s14, 128  }
  0x4e   : > { %380 = vsyncadd (%p259_p8), %s179_s14, 4294967168  ;;  %p14_p10 = scmp.ge.s32.totalorder %s432_s12, 4   ;;  %s542_s6 = smov %s387_s7 }
  0x4f   : > { %s543_s7 = smov %s391_s8  ;;  %s544_s8 = smov %s444_s15 }
  0x50   : > { %s545_s9 = smov %s432_s12  ;;  %16 = sbr.rel (!%p14_p10) target bundleno = 5 (0x5), region = 69 }
  0x55   :  { %185 = vsyncpa [#allocation3], 1 }
  0x56   :  { %187 = vsyncpa [#allocation3 + $0x1], 1 }
  0x57   :  { %188 = vsyncpa [#allocation4], 1 }
  0x58   :  { %190 = vsyncpa [#allocation4 + $0x1], 1 }

</bundles_post_ra>
